<compile_context>
chip_gen: v6e
topology: v6e:2x2x1
jax: 0.10.0
libtpu: 0.0.40
codegen_flags: <defaults>
</compile_context>

<pallas_src>
import jax
import jax.numpy as jnp
from jax.experimental import pallas as pl
from jax.experimental.pallas import tpu as pltpu

NEG_SLOPE = 0.01  # nn.LeakyReLU default negative_slope

IN_DIM = 13
LAYER_DIMS = [(20, IN_DIM), (10, 20), (5, 10), (1, 5)]  # (out, in) per layer

# Largest batch tile (lane axis).  Capped at 32768 because the row-major
# (tile_n, 13) input window lane-pads to 128 (16 MiB per buffer at 32768);
# keep the tile ladder entries multiples of 128 so the lane-dense output
# block is always legal regardless of N.
MAX_TILE_N = 32768
_TILE_LADDER = (32768, 16384, 8192, 4096, 2048, 1024, 512, 256, 128)


def _leaky_relu(x):
    return jnp.where(x > 0, x, NEG_SLOPE * x)


def f1_ffn_kernel(x_ref, w1_ref, b1_ref, w2_ref, b2_ref,
                  w3_ref, b3_ref, w4_ref, b4_ref, o_ref):
    # x_ref: (tile_n, 13) row-major block straight from HBM (no wrapper copy).
    # One in-kernel transpose to feature-major; everything downstream is
    # (features, batch) with the batch on the lane axis.
    xt = x_ref[...].T                                        # (13, tile_n)
    h = jnp.dot(w1_ref[...], xt,
                preferred_element_type=jnp.float32) + b1_ref[...]
    h = _leaky_relu(h)
    h = jnp.dot(w2_ref[...], h,
                preferred_element_type=jnp.float32) + b2_ref[...]
    h = _leaky_relu(h)
    h = jnp.dot(w3_ref[...], h,
                preferred_element_type=jnp.float32) + b3_ref[...]
    h = _leaky_relu(h)
    h = jnp.dot(w4_ref[...], h,
                preferred_element_type=jnp.float32) + b4_ref[...]
    o_ref[...] = h.astype(o_ref.dtype)                       # (1, tile_n) lane-dense


def _choose_tile_n(n):
    n128 = ((n + 127) // 128) * 128              # lane-aligned
    if n128 <= MAX_TILE_N:
        return n128                              # single block, minimal overhang
    # Otherwise pick the largest tile whose padded overhang wastes <= ~12.5%
    # of the real work (avoids nearly a full wasted tile for awkward N).
    for t in _TILE_LADDER:
        if t > MAX_TILE_N:
            continue
        waste = pl.cdiv(n, t) * t - n
        if waste * 8 <= n:
            return t
    return _TILE_LADDER[-1]


def f1_feedforward(x, params):
    """x: (N, 13) float32; params: [(w(out,in), b(out,1)) x 4]. Returns (N, 1)."""
    (w1, b1), (w2, b2), (w3, b3), (w4, b4) = params
    n = x.shape[0]
    tile_n = _choose_tile_n(n)
    grid = (pl.cdiv(n, tile_n),)

    # x streams as row-major (tile_n, 13) blocks; weights/biases stay resident;
    # output streams as lane-dense (1, tile_n) blocks.  Partial last blocks are
    # handled by Pallas (clipped input DMA, masked output writes), so no
    # explicit padding anywhere.
    x_spec = pl.BlockSpec((tile_n, IN_DIM), lambda i: (i, 0))
    resident = lambda a: pl.BlockSpec(a.shape, lambda i: (0, 0))
    out_spec = pl.BlockSpec((1, tile_n), lambda i: (0, i))

    out = pl.pallas_call(
        f1_ffn_kernel,
        out_shape=jax.ShapeDtypeStruct((1, n), jnp.float32),
        grid=grid,
        in_specs=[x_spec,
                  resident(w1), resident(b1),
                  resident(w2), resident(b2),
                  resident(w3), resident(b3),
                  resident(w4), resident(b4)],
        out_specs=out_spec,
        compiler_params=pltpu.CompilerParams(
            # "parallel" lets v7x shard the batch axis across its 2 TCs
            # (no-op on v5e/v6e).
            dimension_semantics=("parallel",),
            # 48 MiB: covers the 32 MiB double-buffered row-major x windows
            # plus temporaries at tile 32768, with headroom under v7x's
            # 64 MiB physical VMEM.  v5e/v6e could go higher / larger tiles.
            vmem_limit_bytes=48 * 1024 * 1024),
    )(x, w1, b1, w2, b2, w3, b3, w4, b4)

    return out.reshape(n, 1)  # (1, N) -> (N, 1) is a free reshape


def init_params(key):
    # Deterministic init mimicking nn.Linear's U(-1/sqrt(fan_in), 1/sqrt(fan_in)).
    # Weights stored (out, in) like torch; biases stored (out, 1) for the
    # feature-major kernel layout.
    params = []
    for (fan_out, fan_in) in LAYER_DIMS:
        key, kw, kb = jax.random.split(key, 3)
        bound = 1.0 / (fan_in ** 0.5)
        w = jax.random.uniform(kw, (fan_out, fan_in), jnp.float32, -bound, bound)
        b = jax.random.uniform(kb, (fan_out, 1), jnp.float32, -bound, bound)
        params.append((w, b))
    return params


def reference(x, params):
    h = x
    for i, (w, b) in enumerate(params):
        h = h @ w.T + b.T
        if i < len(params) - 1:
            h = jnp.where(h > 0, h, NEG_SLOPE * h)
    return h


if __name__ == "__main__":
    key = jax.random.PRNGKey(0)
    kx, kp = jax.random.split(key)
    batch = 8
    x = jax.random.normal(kx, (batch, IN_DIM), jnp.float32)
    params = init_params(kp)

    out = jax.block_until_ready(f1_feedforward(x, params))
    ref = reference(x, params)
    assert out.shape == (batch, 1)
    assert jnp.allclose(out, ref, atol=1e-5, rtol=1e-5)
    print("KERNEL_OK")
</pallas_src>

<mosaic_0001>
module attributes {stable_mosaic.version = 11 : i64} {
  func.func @f1_ffn_kernel(%arg0: i32, %arg1: memref<128x13xf32, #tpu.memory_space<vmem>>, %arg2: memref<20x13xf32, #tpu.memory_space<vmem>>, %arg3: memref<20x1xf32, #tpu.memory_space<vmem>>, %arg4: memref<10x20xf32, #tpu.memory_space<vmem>>, %arg5: memref<10x1xf32, #tpu.memory_space<vmem>>, %arg6: memref<5x10xf32, #tpu.memory_space<vmem>>, %arg7: memref<5x1xf32, #tpu.memory_space<vmem>>, %arg8: memref<1x5xf32, #tpu.memory_space<vmem>>, %arg9: memref<1x1xf32, #tpu.memory_space<vmem>>, %arg10: memref<1x128xf32, #tpu.memory_space<vmem>>) attributes {dimension_semantics = [#tpu.dimension_semantics<parallel>], iteration_bounds = array<i64: 1>, scalar_prefetch = 0 : i64, scratch_operands = 0 : i64, tpu.core_type = #tpu.core_type<tc>, window_params = [{transform_indices = @transform_0, window_bounds = array<i64: 128, 13>}, {pipeline_mode = #tpu.pipeline_mode<synchronous>, transform_indices = @transform_1, window_bounds = array<i64: 20, 13>}, {pipeline_mode = #tpu.pipeline_mode<synchronous>, transform_indices = @transform_2, window_bounds = array<i64: 20, 1>}, {pipeline_mode = #tpu.pipeline_mode<synchronous>, transform_indices = @transform_3, window_bounds = array<i64: 10, 20>}, {pipeline_mode = #tpu.pipeline_mode<synchronous>, transform_indices = @transform_4, window_bounds = array<i64: 10, 1>}, {pipeline_mode = #tpu.pipeline_mode<synchronous>, transform_indices = @transform_5, window_bounds = array<i64: 5, 10>}, {pipeline_mode = #tpu.pipeline_mode<synchronous>, transform_indices = @transform_6, window_bounds = array<i64: 5, 1>}, {pipeline_mode = #tpu.pipeline_mode<synchronous>, transform_indices = @transform_7, window_bounds = array<i64: 1, 5>}, {pipeline_mode = #tpu.pipeline_mode<synchronous>, transform_indices = @transform_8, window_bounds = array<i64: 1, 1>}, {transform_indices = @transform_9, window_bounds = array<i64: 1, 128>}]} {
    %c0 = arith.constant 0 : index
    %c0_0 = arith.constant 0 : index
    %0 = vector.load %arg1[%c0, %c0_0] : memref<128x13xf32, #tpu.memory_space<vmem>>, vector<128x13xf32>
    %1 = tpu.transpose %0, [1, 0] : vector<128x13xf32> -> vector<13x128xf32>
    %c0_1 = arith.constant 0 : index
    %c0_2 = arith.constant 0 : index
    %2 = vector.load %arg2[%c0_1, %c0_2] : memref<20x13xf32, #tpu.memory_space<vmem>>, vector<20x13xf32>
    %cst = arith.constant dense<0.000000e+00> : vector<20x128xf32>
    %3 = tpu.matmul %2, %1, %cst {dimension_numbers = #tpu.dot_dimension_numbers<[1], [0], [0], [1], [0, 0, 1, 1], [], []>} : vector<20x13xf32>, vector<13x128xf32>, vector<20x128xf32> -> vector<20x128xf32>
    %c0_3 = arith.constant 0 : index
    %c0_4 = arith.constant 0 : index
    %4 = vector.load %arg3[%c0_3, %c0_4] : memref<20x1xf32, #tpu.memory_space<vmem>>, vector<20x1xf32>
    %5 = vector.broadcast %4 : vector<20x1xf32> to vector<20x128xf32>
    %6 = arith.addf %3, %5 : vector<20x128xf32>
    %cst_5 = arith.constant 0.000000e+00 : f32
    %7 = vector.broadcast %cst_5 : f32 to vector<20x128xf32>
    %8 = arith.cmpf ogt, %6, %7 : vector<20x128xf32>
    %cst_6 = arith.constant 0.00999999977 : f32
    %9 = vector.broadcast %cst_6 : f32 to vector<20x128xf32>
    %10 = arith.mulf %9, %6 : vector<20x128xf32>
    %11 = arith.select %8, %6, %10 : vector<20x128xi1>, vector<20x128xf32>
    %c0_7 = arith.constant 0 : index
    %c0_8 = arith.constant 0 : index
    %12 = vector.load %arg4[%c0_7, %c0_8] : memref<10x20xf32, #tpu.memory_space<vmem>>, vector<10x20xf32>
    %cst_9 = arith.constant dense<0.000000e+00> : vector<10x128xf32>
    %13 = tpu.matmul %12, %11, %cst_9 {dimension_numbers = #tpu.dot_dimension_numbers<[1], [0], [0], [1], [0, 0, 1, 1], [], []>} : vector<10x20xf32>, vector<20x128xf32>, vector<10x128xf32> -> vector<10x128xf32>
    %c0_10 = arith.constant 0 : index
    %c0_11 = arith.constant 0 : index
    %14 = vector.load %arg5[%c0_10, %c0_11] : memref<10x1xf32, #tpu.memory_space<vmem>>, vector<10x1xf32>
    %15 = vector.broadcast %14 : vector<10x1xf32> to vector<10x128xf32>
    %16 = arith.addf %13, %15 : vector<10x128xf32>
    %cst_12 = arith.constant 0.000000e+00 : f32
    %17 = vector.broadcast %cst_12 : f32 to vector<10x128xf32>
    %18 = arith.cmpf ogt, %16, %17 : vector<10x128xf32>
    %cst_13 = arith.constant 0.00999999977 : f32
    %19 = vector.broadcast %cst_13 : f32 to vector<10x128xf32>
    %20 = arith.mulf %19, %16 : vector<10x128xf32>
    %21 = arith.select %18, %16, %20 : vector<10x128xi1>, vector<10x128xf32>
    %c0_14 = arith.constant 0 : index
    %c0_15 = arith.constant 0 : index
    %22 = vector.load %arg6[%c0_14, %c0_15] : memref<5x10xf32, #tpu.memory_space<vmem>>, vector<5x10xf32>
    %cst_16 = arith.constant dense<0.000000e+00> : vector<5x128xf32>
    %23 = tpu.matmul %22, %21, %cst_16 {dimension_numbers = #tpu.dot_dimension_numbers<[1], [0], [0], [1], [0, 0, 1, 1], [], []>} : vector<5x10xf32>, vector<10x128xf32>, vector<5x128xf32> -> vector<5x128xf32>
    %c0_17 = arith.constant 0 : index
    %c0_18 = arith.constant 0 : index
    %24 = vector.load %arg7[%c0_17, %c0_18] : memref<5x1xf32, #tpu.memory_space<vmem>>, vector<5x1xf32>
    %25 = vector.broadcast %24 : vector<5x1xf32> to vector<5x128xf32>
    %26 = arith.addf %23, %25 : vector<5x128xf32>
    %cst_19 = arith.constant 0.000000e+00 : f32
    %27 = vector.broadcast %cst_19 : f32 to vector<5x128xf32>
    %28 = arith.cmpf ogt, %26, %27 : vector<5x128xf32>
    %cst_20 = arith.constant 0.00999999977 : f32
    %29 = vector.broadcast %cst_20 : f32 to vector<5x128xf32>
    %30 = arith.mulf %29, %26 : vector<5x128xf32>
    %31 = arith.select %28, %26, %30 : vector<5x128xi1>, vector<5x128xf32>
    %c0_21 = arith.constant 0 : index
    %c0_22 = arith.constant 0 : index
    %32 = vector.load %arg8[%c0_21, %c0_22] : memref<1x5xf32, #tpu.memory_space<vmem>>, vector<1x5xf32>
    %cst_23 = arith.constant dense<0.000000e+00> : vector<1x128xf32>
    %33 = tpu.matmul %32, %31, %cst_23 {dimension_numbers = #tpu.dot_dimension_numbers<[1], [0], [0], [1], [0, 0, 1, 1], [], []>} : vector<1x5xf32>, vector<5x128xf32>, vector<1x128xf32> -> vector<1x128xf32>
    %c0_24 = arith.constant 0 : index
    %c0_25 = arith.constant 0 : index
    %34 = vector.load %arg9[%c0_24, %c0_25] : memref<1x1xf32, #tpu.memory_space<vmem>>, vector<1x1xf32>
    %35 = vector.broadcast %34 : vector<1x1xf32> to vector<1x128xf32>
    %36 = arith.addf %33, %35 : vector<1x128xf32>
    %c0_26 = arith.constant 0 : index
    %c0_27 = arith.constant 0 : index
    %37 = vector.load %arg10[%c0_26, %c0_27] : memref<1x128xf32, #tpu.memory_space<vmem>>, vector<1x128xf32>
    tpu.vector_store %arg10[%c0_26, %c0_27], %36 {strides = array<i32>} : memref<1x128xf32, #tpu.memory_space<vmem>>, vector<1x128xf32>,
    return
  }
  func.func @transform_0(%arg0: i32) -> (i32, i32) {
    %c0_i32 = arith.constant 0 : i32
    %c0_i32_0 = arith.constant 0 : i32
    return %arg0, %c0_i32 : i32, i32
  }
  func.func @transform_1(%arg0: i32) -> (i32, i32) {
    %c0_i32 = arith.constant 0 : i32
    %c0_i32_0 = arith.constant 0 : i32
    %c0_i32_1 = arith.constant 0 : i32
    return %c0_i32, %c0_i32_0 : i32, i32
  }
  func.func @transform_2(%arg0: i32) -> (i32, i32) {
    %c0_i32 = arith.constant 0 : i32
    %c0_i32_0 = arith.constant 0 : i32
    %c0_i32_1 = arith.constant 0 : i32
    return %c0_i32, %c0_i32_0 : i32, i32
  }
  func.func @transform_3(%arg0: i32) -> (i32, i32) {
    %c0_i32 = arith.constant 0 : i32
    %c0_i32_0 = arith.constant 0 : i32
    %c0_i32_1 = arith.constant 0 : i32
    return %c0_i32, %c0_i32_0 : i32, i32
  }
  func.func @transform_4(%arg0: i32) -> (i32, i32) {
    %c0_i32 = arith.constant 0 : i32
    %c0_i32_0 = arith.constant 0 : i32
    %c0_i32_1 = arith.constant 0 : i32
    return %c0_i32, %c0_i32_0 : i32, i32
  }
  func.func @transform_5(%arg0: i32) -> (i32, i32) {
    %c0_i32 = arith.constant 0 : i32
    %c0_i32_0 = arith.constant 0 : i32
    %c0_i32_1 = arith.constant 0 : i32
    return %c0_i32, %c0_i32_0 : i32, i32
  }
  func.func @transform_6(%arg0: i32) -> (i32, i32) {
    %c0_i32 = arith.constant 0 : i32
    %c0_i32_0 = arith.constant 0 : i32
    %c0_i32_1 = arith.constant 0 : i32
    return %c0_i32, %c0_i32_0 : i32, i32
  }
  func.func @transform_7(%arg0: i32) -> (i32, i32) {
    %c0_i32 = arith.constant 0 : i32
    %c0_i32_0 = arith.constant 0 : i32
    %c0_i32_1 = arith.constant 0 : i32
    return %c0_i32, %c0_i32_0 : i32, i32
  }
  func.func @transform_8(%arg0: i32) -> (i32, i32) {
    %c0_i32 = arith.constant 0 : i32
    %c0_i32_0 = arith.constant 0 : i32
    %c0_i32_1 = arith.constant 0 : i32
    return %c0_i32, %c0_i32_0 : i32, i32
  }
  func.func @transform_9(%arg0: i32) -> (i32, i32) {
    %c0_i32 = arith.constant 0 : i32
    %c0_i32_0 = arith.constant 0 : i32
    return %c0_i32, %arg0 : i32, i32
  }
}

</mosaic_0001>

<bundles_post_ra>
// kernel: tpu_custom_call.1
= control target key start
LH: loop header
LB: loop body
LE: loop exit
PB: predicated region body
PF: predicated region fallthrough
CT: control target
= control target key end

     0   :  { %s859_s0 = inlined_call_operand.vmem [shape: f32[8,13], index: 0, kind: input, shape index: {}]   ;;  %s860_s1 = inlined_call_operand.vmem [shape: f32[20,13], index: 1, kind: input, shape index: {}]   ;;  %s861_s2 = inlined_call_operand.vmem [shape: f32[20,1], index: 2, kind: input, shape index: {}]   ;;  %s862_s3 = inlined_call_operand.vmem [shape: f32[10,20], index: 3, kind: input, shape index: {}]   ;;  %s863_s4 = inlined_call_operand.vmem [shape: f32[10,1], index: 4, kind: input, shape index: {}]   ;;  %s864_s5 = inlined_call_operand.vmem [shape: f32[5,10], index: 5, kind: input, shape index: {}]   ;;  %s865_s6 = inlined_call_operand.vmem [shape: f32[5,1], index: 6, kind: input, shape index: {}]   ;;  %s866_s7 = inlined_call_operand.vmem [shape: f32[1,5], index: 7, kind: input, shape index: {}]   ;;  %s867_s8 = inlined_call_operand.<no memory space> [shape: f32[1,1], index: 8, kind: input, shape index: {}]   ;;  %s868_s9 = inlined_call_operand.hbm [shape: f32[1,8], index: 9, kind: output, shape index: {}]  }
   0x1   :  { %v14_v0 = vstv %s867_s8 }
   0x2   :  { %15 = vst [vmem:[#allocation2] sm:$0x1] %v14_v0 }
   0x3   :  { %v50_v1 = vld [vmem:[%s859_s0 + $0x78] sm:$0xff]  ;;  %vm72_vm0 = vcmask 105472   ;;  %v662_v2 = vmov 0.0   ;;  %vm663_vm1 = vmmov 0   ;;  %v664_v3 = vmov 0   ;;  %v49_v4 = vld [vmem:[%s859_s0 + $0x70] sm:$0xff] }
   0x4   :  { %572 = vmatprep.subr.mxu0 %v662_v2  ;;  %604 = vmatprep.mubr.msk.f32.mxu0 %vm663_vm1, %v662_v2  ;;  %v56_v5 = vld [vmem:[%s861_s2 + $0x10] sm:$0xf]  ;;  %v48_v6 = vld [vmem:[%s859_s0 + $0x68] sm:$0xff]  ;;  %v54_v7 = vld [vmem:[%s861_s2] sm:$0xff] }
   0x5   :  { %573 = vmatpush3.xpose.msk.msra.mxu0 %vm72_vm0, %v50_v1  ;;  %638 = vset.pattern.permute.xlu0 %v664_v3  ;;  %v55_v8 = vld [vmem:[%s861_s2 + $0x8] sm:$0xff] }
   0x6   :  { %574 = vmatprep.subr.mxu0 %v662_v2  ;;  %639 = vset.pattern.permute.xlu1 %v664_v3 }
   0x7   :  { %69 = vperm.xlu0 %638, %v56_v5   ;;  %59 = vperm.xlu1 %639, %v54_v7  }
   0x9   :  { %575 = vmatpush3.xpose.msk.msra.mxu0 %vm72_vm0, %v49_v4 }
   0xa   :  { %576 = vmatprep.subr.mxu0 %v662_v2 }
   0xb   :  { %16 = vsyncpa [#allocation4], 0  ;;  %v222_v9 = vld [vmem:[%s863_s4 + $0x8] sm:$0x3]  ;;  %v47_v10 = vld [vmem:[%s859_s0 + $0x60] sm:$0xff]  ;;  %64 = vperm.xlu0 %638, %v55_v8   ;;  %vm233_vm2 = vcmask 162816   ;;  %v420_v4 = vlaneseq }
   0xc   :  { %v221_v11 = vld [vmem:[%s863_s4] sm:$0xff]  ;;  %230 = vperm.xlu1 %639, %v222_v9   ;;  %v46_v13 = vld [vmem:[%s859_s0 + $0x58] sm:$0xff]  ;;  %v45_v15 = vld [vmem:[%s859_s0 + $0x50] sm:$0xff]  ;;  %vm240_vm4 = vcmask 1043456   ;;  %vm336_vm8 = vcmask 1041408   ;;  %vm332_vm10 = vcmask 80896  }
   0xd   :  { %577 = vmatpush3.xpose.msk.msra.mxu0 %vm72_vm0, %v48_v6  ;;  %v326_v12 = vld [vmem:[%s865_s6] sm:$0x1f]  ;;  %v44_v16 = vld [vmem:[%s859_s0 + $0x48] sm:$0xff]  ;;  %v42_v18 = vld [vmem:[%s859_s0 + $0x38] sm:$0xff]  ;;  %vm428_vm12 = vcmask 1044480   ;;  %vm424_vm13 = vcmask 39936  }
   0xe   :  { %578 = vmatprep.subr.mxu0 %v662_v2  ;;  %v414_v14 = vld [vmem:[#allocation2] sm:$0x1]  ;;  %v41_v19 = vld [vmem:[%s859_s0 + $0x30] sm:$0xff]  ;;  %v40_v20 = vld [vmem:[%s859_s0 + $0x28] sm:$0xff]  ;;  %v421_v5 = vshrl.u32 %v420_v4, 7  ;;  %s665_s14 = smov [#allocation3]  }
   0xf   :  { %225 = vperm.xlu0 %638, %v221_v11   ;;  %v43_v17 = vld [vmem:[%s859_s0 + $0x40] sm:$0xff]  ;;  %v38_v22 = vld [vmem:[%s859_s0 + $0x18] sm:$0xff]  ;;  %v37_v23 = vld [vmem:[%s859_s0 + $0x10] sm:$0xff]  ;;  %s509_s15 = sshll.u32 %s665_s14, 4  ;;  %s510_s15 = int_to_ptr.vmem [resolvable:$true] %s509_s15 }
  0x10   :  { %329 = vperm.xlu1 %639, %v326_v12   ;;  %v39_v21 = vld [vmem:[%s859_s0 + $0x20] sm:$0xff]  ;;  %v36_v24 = vld [vmem:[%s859_s0 + $0x8] sm:$0xff]  ;;  %v53_v28 = vld [vmem:[%s860_s1 + $0x10] sm:$0xf]  ;;  %v422_v6 = vsub.s32 0, %v421_v5  ;;  %s640_s16 = scalar_lea.vmem %s510_s15, 16  ;;  %p645_p1 = scmp.lt.s32.totalorder %s510_s15, %s510_s15 }
  0x11   :  { %579 = vmatpush3.xpose.msk.msra.mxu0 %vm72_vm0, %v47_v10  ;;  %v35_v25 = vld [vmem:[%s859_s0] sm:$0xff]  ;;  %v52_v27 = vld [vmem:[%s860_s1 + $0x8] sm:$0xff]  ;;  %p641_p0 = scmp.ne.s32.totalorder %s510_s15, %s640_s16  ;;  %s644_s17 = scalar_lea.vmem %s510_s15, 32 }
  0x12   :  { %580 = vmatprep.subr.mxu0 %v662_v2  ;;  %v51_v26 = vld [vmem:[%s860_s1] sm:$0xff]  ;;  %v220_v48 = vld [vmem:[%s862_s3 + $0x8] sm:$0x3]  ;;  %p646_p2 = scmp.lt.s32.totalorder %s644_s17, %s640_s16 }
  0x13   :  { %417 = vperm.xlu0 %638, %v414_v14   ;;  %v219_v29 = vld [vmem:[%s862_s3] sm:$0xff] }
  0x14   :  { %619 = vmatprep.mubr.msk.f32.mxu1 %vm233_vm2, %v219_v29  ;;  %v325_v58 = vld [vmem:[%s864_s5] sm:$0x1f]  ;;  %p647_p3 = por %p646_p2, %p645_p1 }
  0x15   :  { %581 = vmatpush3.xpose.msk.msra.mxu0 %vm72_vm0, %v46_v13  ;;  %v413_v1 = vld [vmem:[%s866_s7] sm:$0x1] }
  0x16   :  { %582 = vmatprep.subr.mxu0 %v662_v2  ;;  %p648_p4 = pnand %p647_p3, %p641_p0 }
  0x19   :  { %583 = vmatpush3.xpose.msk.msra.mxu0 %vm72_vm0, %v45_v15 }
  0x1a   :  { %584 = vmatprep.subr.mxu0 %v662_v2 }
  0x1d   :  { %585 = vmatpush3.xpose.msk.msra.mxu0 %vm72_vm0, %v44_v16 }
  0x1e   :  { %586 = vmatprep.subr.mxu0 %v662_v2 }
  0x21   :  { %587 = vmatpush3.xpose.msk.msra.mxu0 %vm72_vm0, %v43_v17 }
  0x22   :  { %588 = vmatprep.subr.mxu0 %v662_v2 }
  0x25   :  { %589 = vmatpush3.xpose.msk.msra.mxu0 %vm72_vm0, %v42_v18 }
  0x26   :  { %590 = vmatprep.subr.mxu0 %v662_v2 }
  0x29   :  { %591 = vmatpush3.xpose.msk.msra.mxu0 %vm72_vm0, %v41_v19 }
  0x2a   :  { %592 = vmatprep.subr.mxu0 %v662_v2 }
  0x2d   :  { %593 = vmatpush3.xpose.msk.msra.mxu0 %vm72_vm0, %v40_v20 }
  0x2e   :  { %594 = vmatprep.subr.mxu0 %v662_v2 }
  0x31   :  { %595 = vmatpush3.xpose.msk.msra.mxu0 %vm72_vm0, %v39_v21 }
  0x32   :  { %596 = vmatprep.subr.mxu0 %v662_v2 }
  0x35   :  { %597 = vmatpush3.xpose.msk.msra.mxu0 %vm72_vm0, %v38_v22 }
  0x36   :  { %598 = vmatprep.subr.mxu0 %v662_v2 }
  0x39   :  { %599 = vmatpush3.xpose.msk.msra.mxu0 %vm72_vm0, %v37_v23 }
  0x3a   :  { %600 = vmatprep.subr.mxu0 %v662_v2 }
  0x3d   :  { %601 = vmatpush3.xpose.msk.msra.mxu0 %vm72_vm0, %v36_v24 }
  0x3e   :  { %602 = vmatprep.subr.mxu0 %v662_v2 }
  0x41   :  { %603 = vmatpush3.xpose.msk.msra.mxu0 %vm72_vm0, %v35_v25 }
  0x44   :  { %605 = vmatmul.mubr.msk.f32.vlgmr.msra.gmra.mxu0 %vm72_vm0, %v51_v26 }
  0x45   :  { %607 = vmatprep.mubr.msk.f32.mxu0 %vm663_vm1, %v662_v2 }
  0x48   :  { %608 = vmatmul.mubr.msk.f32.gmra.mxu0 %vm72_vm0, %v52_v27 }
  0x49   :  { %610 = vmatprep.mubr.msk.f32.mxu0 %vm663_vm1, %v662_v2 }
  0x4c   :  { %611 = vmatmul.mubr.msk.f32.gmra.mxu0 %vm72_vm0, %v53_v28 }
  0x82   :  { %v70_v30 = vpop.permute.xlu0 %69  ;;  %v60_v34 = vpop.permute.xlu1 %59 }
  0x86   :  { %v65_v35 = vpop.permute.xlu0 %64 }
  0x87   :  { %v231_v49 = vpop.permute.xlu1 %230 }
  0x8a   :  { %v226_v52 = vpop.permute.xlu0 %225 }
  0x8b   :  { %v330_v60 = vpop.permute.xlu1 %329 }
  0x8e   :  { %v418_v7 = vpop.permute.xlu0 %417 }
 0x104   :  { %v196_v31 = vpop.f32.mrf.mxu0 }
 0x105   :  { %v197_v39 = vadd.f32 %v196_v31, %v60_v34 }
 0x106   :  { %v606_v32 = vpop.f32.mrf.mxu0 }
 0x107   :  { %v213_v44 = vmul.f32 0.01, %v197_v39  ;;  %vm210_vm6 = vcmp.gt.f32.partialorder %v197_v39, 0.0 }
 0x108   :  { %v201_v33 = vpop.f32.mrf.mxu0 }
 0x109   :  { %v202_v37 = vadd.f32 %v201_v33, %v65_v35  ;;  %v216_v47 = vsel %vm210_vm6, %v197_v39, %v213_v44 }
 0x10a   :  { %v609_v36 = vpop.f32.mrf.mxu0 }
 0x10b   :  { %v214_v42 = vmul.f32 0.01, %v202_v37  ;;  %vm211_vm5 = vcmp.gt.f32.partialorder %v202_v37, 0.0 }
 0x10c   :  { %v206_v38 = vpop.f32.mrf.mxu0 }
 0x10d   :  { %v207_v40 = vadd.f32 %v206_v38, %v70_v30  ;;  %v217_v46 = vsel %vm211_vm5, %v202_v37, %v214_v42 }
 0x10e   :  { %v612_v41 = vpop.f32.mrf.mxu0 }
 0x10f   :  { %vm212_vm3 = vcmp.gt.f32.partialorder %v207_v40, 0.0  ;;  %v215_v43 = vmul.f32 0.01, %v207_v40 }
 0x111   :  { %v218_v45 = vsel %vm212_vm3, %v207_v40, %v215_v43 }
 0x112   :  { %613 = vmatprep.subr.msk.mxu1 %vm240_vm4, %v218_v45 }
 0x113   :  { %614 = vmatpush3.msk.msra.mxu1 %vm240_vm4, %v218_v45 }
 0x114   :  { %615 = vmatprep.subr.mxu1 %v217_v46 }
 0x115   :  { %616 = vmatpush3.msra.mxu1 %v217_v46 }
 0x116   :  { %617 = vmatprep.subr.mxu1 %v216_v47 }
 0x117   :  { %618 = vmatpush3.msra.mxu1 %v216_v47 }
 0x118   :  { %620 = vmatmul.mubr.msk.f32.vlgmr.msra.gmra.mxu1 %vm233_vm2, %v220_v48  ;;  %622 = vmatprep.subr.mxu1 %v662_v2 }
 0x119   :  { %626 = vmatprep.mubr.msk.f32.mxu1 %vm663_vm1, %v662_v2 }
 0x1d8   :  { %v621_v50 = vpop.f32.mrf.mxu1 }
 0x1d9   :  { %v316_v51 = vadd.f32 %v621_v50, %v231_v49 }
 0x1da   :  { %v310_v53 = vpop.f32.mrf.mxu1 }
 0x1db   :  { %vm320_vm7 = vcmp.gt.f32.partialorder %v316_v51, 0.0  ;;  %v322_v54 = vmul.f32 0.01, %v316_v51  ;;  %v311_v55 = vadd.f32 %v310_v53, %v226_v52 }
 0x1dd   :  { %v324_v56 = vsel %vm320_vm7, %v316_v51, %v322_v54  ;;  %vm319_vm9 = vcmp.gt.f32.partialorder %v311_v55, 0.0  ;;  %v321_v57 = vmul.f32 0.01, %v311_v55 }
 0x1de   :  { %623 = vmatpush3.msk.msra.mxu1 %vm336_vm8, %v324_v56 }
 0x1df   :  { %624 = vmatprep.subr.mxu1 %v662_v2  ;;  %v323_v59 = vsel %vm319_vm9, %v311_v55, %v321_v57 }
 0x1e0   :  { %625 = vmatpush3.msra.mxu1 %v323_v59 }
 0x1e1   :  { %627 = vmatmul.mubr.msk.f32.vlgmr.msra.gmra.mxu1 %vm332_vm10, %v325_v58  ;;  %629 = vmatprep.subr.mxu1 %v662_v2 }
 0x1e2   :  { %631 = vmatprep.mubr.msk.f32.mxu1 %vm663_vm1, %v662_v2  ;;  %v423_v2 = vrot.slane %v418_v7, %v422_v6 }
 0x2a1   :  { %v406_v61 = vpop.f32.mrf.mxu1 }
 0x2a2   :  { %v407_v62 = vadd.f32 %v406_v61, %v330_v60 }
 0x2a3   :  { %v628_v63 = vpop.f32.mrf.mxu1 }
 0x2a4   :  { %vm410_vm11 = vcmp.gt.f32.partialorder %v407_v62, 0.0  ;;  %v411_v0 = vmul.f32 0.01, %v407_v62 }
 0x2a6   :  { %v412_v3 = vsel %vm410_vm11, %v407_v62, %v411_v0 }
 0x2a7   :  { %630 = vmatpush3.msk.msra.mxu1 %vm428_vm12, %v412_v3 }
 0x2a8   :  { %632 = vmatmul.mubr.msk.f32.vlgmr.msra.gmra.mxu1 %vm424_vm13, %v413_v1 }
 0x368   :  { %v498_v8 = vpop.f32.mrf.mxu1 }
 0x369   :  { %v499_v9 = vadd.f32 %v498_v8, %v423_v2 }
 0x36a   :  { %v633_v10 = vpop.f32.mrf.mxu1 }
 0x36b   :  { %502 = vst [vmem:[#allocation3] sm:$0x1] %v499_v9 }
 0x36c   :  { %651 = shalt.err (!%p648_p4)
}
 0x36d   :  { %512 = dma.vmem_to_hbm [thread:$0]  %s510_s15, 16, %s868_s9, [#allocation4]  }
 0x36e   :  { %660 = dma.done.wait [#allocation4], 16  }
 0x36f   :  { %661 = vsyncadd [#allocation4], 4294967280 }
 0x370   :  { %516 = vsyncpa [#allocation4], 1 }

</bundles_post_ra>
